<compile_context>
chip_gen: v5e
topology: v5e:2x2
jax: 0.10.0
libtpu: 0.0.40
codegen_flags: <defaults>
</compile_context>

<pallas_src>
import functools

import jax
import jax.numpy as jnp
from jax.experimental import pallas as pl
from jax.experimental.pallas import tpu as pltpu

_EPS = 1e-5


def _round_up(n, m):
    return ((n + m - 1) // m) * m


def _default_tiling():
    """(target_tile_bytes, vmem_limit_bytes) chosen per TPU generation."""
    vmem_bytes = None
    try:
        vmem_bytes = getattr(pltpu.get_tpu_info(), "vmem_capacity_bytes", None)
    except Exception:
        pass
    if vmem_bytes is not None and vmem_bytes >= 100 * 1024 * 1024:
        # v5e / v6e class (128 MiB VMEM): 4 MiB steps are already >85% of roofline.
        return 4 * 1024 * 1024, 48 * 1024 * 1024
    if vmem_bytes is not None:
        # v7x class (64 MiB VMEM, ~3.2 TB/s HBM): larger steps amortize the fixed
        # per-step overhead; 2 in-bufs + 2 out-bufs = 4 x 6 MiB = 24 MiB < 40 MiB.
        return 6 * 1024 * 1024, 40 * 1024 * 1024
    # Unknown generation: defaults that are safe everywhere.
    return 4 * 1024 * 1024, 40 * 1024 * 1024


# ---------------------------------------------------------------------------
# kernels
# ---------------------------------------------------------------------------

def _ln_cfirst_kernel(x_ref, w_ref, b_ref, o_ref, *, inv_c, subtract_mean):
    # x_ref: (bb, C, TL) tile -- channels on sublanes, pixels on lanes (lane-dense).
    x = x_ref[...].astype(jnp.float32)
    mean = jnp.sum(x, axis=1, keepdims=True) * inv_c            # (bb, 1, TL)
    xc = x - mean
    var = jnp.sum(xc * xc, axis=1, keepdims=True) * inv_c       # two-pass, unbiased=False
    inv = jax.lax.rsqrt(var + _EPS)
    num = xc if subtract_mean else x                            # BiasFree keeps x un-centered
    y = num * inv * w_ref[...] + b_ref[...]                     # w/b: (1, C, 1) f32
    o_ref[...] = y.astype(o_ref.dtype)


def _ln_clast_kernel(x_ref, w_ref, b_ref, o_ref, *, inv_c, subtract_mean):
    # x_ref: (TM, C) row tile, normalized over the last dim (only used when C >= 128).
    x = x_ref[...].astype(jnp.float32)
    mean = jnp.sum(x, axis=-1, keepdims=True) * inv_c
    xc = x - mean
    var = jnp.sum(xc * xc, axis=-1, keepdims=True) * inv_c
    inv = jax.lax.rsqrt(var + _EPS)
    num = xc if subtract_mean else x
    o_ref[...] = (num * inv * w_ref[...] + b_ref[...]).astype(o_ref.dtype)


# ---------------------------------------------------------------------------
# channels-first (B, C, L) core call
# ---------------------------------------------------------------------------

def _layernorm_cfirst_call(x3, weight, bias, *, subtract_mean,
                           target_tile_bytes, vmem_limit_bytes):
    B, C, L = x3.shape
    itemsize = x3.dtype.itemsize
    w3 = weight.astype(jnp.float32).reshape(1, C, 1)
    if bias is None:
        bias = jnp.zeros((C,), jnp.float32)
    b3 = bias.astype(jnp.float32).reshape(1, C, 1)

    # lane (pixel) tile: multiple of 128, or the full extent when L < 128
    if L <= 128:
        tl = L
    else:
        want = max(128, (target_tile_bytes // max(C * itemsize, 1)) // 128 * 128)
        tl = max(128, min(want, (L // 128) * 128))

    # batch tile: pack images into each DMA step until ~target_tile_bytes
    step_bytes = C * tl * itemsize
    bb = max(1, min(B, target_tile_bytes // max(step_bytes, 1)))

    # keep >= 4 grid steps when the data allows it (>= 2 per TensorCore on v7x)
    def _steps(bb_, tl_):
        return pl.cdiv(B, bb_) * pl.cdiv(L, tl_)

    while _steps(bb, tl) < 4 and bb > 1:
        bb = (bb + 1) // 2
    while _steps(bb, tl) < 4 and tl > 128:
        tl = max(128, ((tl // 2) // 128) * 128)

    grid = (pl.cdiv(B, bb), pl.cdiv(L, tl))
    kernel = functools.partial(_ln_cfirst_kernel, inv_c=1.0 / C,
                               subtract_mean=subtract_mean)
    return pl.pallas_call(
        kernel,
        out_shape=jax.ShapeDtypeStruct((B, C, L), x3.dtype),
        grid=grid,
        in_specs=[
            pl.BlockSpec((bb, C, tl), lambda i, j: (i, 0, j)),
            pl.BlockSpec((1, C, 1), lambda i, j: (0, 0, 0)),
            pl.BlockSpec((1, C, 1), lambda i, j: (0, 0, 0)),
        ],
        out_specs=pl.BlockSpec((bb, C, tl), lambda i, j: (i, 0, j)),
        compiler_params=pltpu.CompilerParams(
            dimension_semantics=("parallel", "parallel"),
            vmem_limit_bytes=vmem_limit_bytes,
        ),
    )(x3, w3, b3)


# ---------------------------------------------------------------------------
# public BCHW path (fused to_3d -> LayerNorm -> to_4d, as used by the module)
# ---------------------------------------------------------------------------

def _layernorm_bchw(x, weight, bias, *, subtract_mean,
                    target_tile_bytes=None, vmem_limit_bytes=None):
    B, C, H, W = x.shape
    assert weight.shape == (C,)
    if target_tile_bytes is None or vmem_limit_bytes is None:
        tb, vl = _default_tiling()
        target_tile_bytes = target_tile_bytes or tb
        vmem_limit_bytes = vmem_limit_bytes or vl
    x3 = x.reshape(B, C, H * W)                    # contiguous -> free reshape
    out = _layernorm_cfirst_call(x3, weight, bias, subtract_mean=subtract_mean,
                                 target_tile_bytes=target_tile_bytes,
                                 vmem_limit_bytes=vmem_limit_bytes)
    return out.reshape(B, C, H, W)


def withbias_layernorm_bchw(x, weight, bias, **kw):
    """Fused to_3d -> WithBias_LayerNorm -> to_4d (the module's default path)."""
    return _layernorm_bchw(x, weight, bias, subtract_mean=True, **kw)


def biasfree_layernorm_bchw(x, weight, **kw):
    """Fused to_3d -> BiasFree_LayerNorm -> to_4d."""
    return _layernorm_bchw(x, weight, None, subtract_mean=False, **kw)


# ---------------------------------------------------------------------------
# generic channels-last fallback (raw BiasFree/WithBias_LayerNorm interface)
# ---------------------------------------------------------------------------

def _layernorm_channels_last(x, weight, bias, *, subtract_mean,
                             target_tile_bytes=None, vmem_limit_bytes=None):
    orig_shape = x.shape
    C = orig_shape[-1]
    assert weight.shape == (C,)
    if target_tile_bytes is None or vmem_limit_bytes is None:
        tb, vl = _default_tiling()
        target_tile_bytes = target_tile_bytes or tb
        vmem_limit_bytes = vmem_limit_bytes or vl

    x2d = x.reshape(-1, C)
    rows = x2d.shape[0]

    if C < 128 and rows >= 128:
        # Lane-dense route: a (rows, C<128) output block would force masked
        # vst.msk partial stores (worst on v5e's single vst slot).  Present the
        # slab channels-first instead; the wrapper transposes are XLA layout
        # plumbing outside the kernel.
        xT = jnp.swapaxes(x2d, 0, 1)[None]         # (1, C, rows)
        outT = _layernorm_cfirst_call(xT, weight, bias, subtract_mean=subtract_mean,
                                      target_tile_bytes=target_tile_bytes,
                                      vmem_limit_bytes=vmem_limit_bytes)
        return jnp.swapaxes(outT[0], 0, 1).reshape(orig_shape)

    itemsize = x.dtype.itemsize
    tm = max(8, min(target_tile_bytes // max(C * itemsize, 1), 8192))
    tm = (tm // 8) * 8
    if tm >= rows:
        if rows >= 32:
            tm = max(8, _round_up(pl.cdiv(rows, 4), 8))   # ~4 steps (2/core on v7x)
        else:
            tm = rows                                     # tiny: single full-extent block

    if bias is None:
        bias = jnp.zeros((C,), jnp.float32)
    w2 = weight.astype(jnp.float32).reshape(1, C)
    b2 = bias.astype(jnp.float32).reshape(1, C)

    grid = (pl.cdiv(rows, tm),)
    kernel = functools.partial(_ln_clast_kernel, inv_c=1.0 / C,
                               subtract_mean=subtract_mean)
    out = pl.pallas_call(
        kernel,
        out_shape=jax.ShapeDtypeStruct((rows, C), x.dtype),
        grid=grid,
        in_specs=[
            pl.BlockSpec((tm, C), lambda i: (i, 0)),
            pl.BlockSpec((1, C), lambda i: (0, 0)),
            pl.BlockSpec((1, C), lambda i: (0, 0)),
        ],
        out_specs=pl.BlockSpec((tm, C), lambda i: (i, 0)),
        compiler_params=pltpu.CompilerParams(
            dimension_semantics=("parallel",),
            vmem_limit_bytes=vmem_limit_bytes,
        ),
    )(x2d, w2, b2)
    return out.reshape(orig_shape)


def withbias_layernorm(x, weight, bias, **kw):
    """Generic channels-last WithBias_LayerNorm: x (..., C), weight/bias (C,)."""
    return _layernorm_channels_last(x, weight, bias, subtract_mean=True, **kw)


def biasfree_layernorm(x, weight, **kw):
    """Generic channels-last BiasFree_LayerNorm: x (..., C), weight (C,)."""
    return _layernorm_channels_last(x, weight, None, subtract_mean=False, **kw)


# ---------------------------------------------------------------------------
# self-test
# ---------------------------------------------------------------------------

if __name__ == "__main__":
    key = jax.random.PRNGKey(0)
    ks = jax.random.split(key, 8)

    # --- 1) module layout: the TransformerBlocks inside PredictiveModuleMIMO see
    #        (B, nf, H, W) feature maps (nf=64); default LayerNorm_type='withbias'.
    B, C, H, W = 2, 64, 16, 16
    x4 = jax.random.normal(ks[0], (B, C, H, W), dtype=jnp.float32)
    w = 0.5 + jax.random.uniform(ks[1], (C,), dtype=jnp.float32)
    b = 0.1 * jax.random.normal(ks[2], (C,), dtype=jnp.float32)

    x3d = jnp.transpose(x4.reshape(B, C, H * W), (0, 2, 1))       # to_3d: b (hw) c
    mu = jnp.mean(x3d, axis=-1, keepdims=True)
    sg = jnp.var(x3d, axis=-1, keepdims=True)                     # unbiased=False

    out_wb = jax.block_until_ready(withbias_layernorm_bchw(x4, w, b))
    ref_wb = jnp.transpose((x3d - mu) / jnp.sqrt(sg + 1e-5) * w + b,
                           (0, 2, 1)).reshape(B, C, H, W)
    assert out_wb.shape == x4.shape
    assert jnp.allclose(out_wb, ref_wb, atol=1e-5, rtol=1e-5), "withbias bchw mismatch"

    out_bf = jax.block_until_ready(biasfree_layernorm_bchw(x4, w))
    ref_bf = jnp.transpose(x3d / jnp.sqrt(sg + 1e-5) * w,
                           (0, 2, 1)).reshape(B, C, H, W)
    assert jnp.allclose(out_bf, ref_bf, atol=1e-5, rtol=1e-5), "biasfree bchw mismatch"

    # --- 2) generic channels-last, C < 128 -> lane-dense transpose route, ragged rows.
    Bs, Ls, Cs = 2, 77, 32
    xs = jax.random.normal(ks[3], (Bs, Ls, Cs), dtype=jnp.float32)
    ws = 0.5 + jax.random.uniform(ks[4], (Cs,), dtype=jnp.float32)
    bs = 0.1 * jax.random.normal(ks[5], (Cs,), dtype=jnp.float32)
    outs = jax.block_until_ready(withbias_layernorm(xs, ws, bs))
    mus = jnp.mean(xs, axis=-1, keepdims=True)
    sgs = jnp.var(xs, axis=-1, keepdims=True)
    refs = (xs - mus) / jnp.sqrt(sgs + 1e-5) * ws + bs
    assert outs.shape == xs.shape
    assert jnp.allclose(outs, refs, atol=1e-5, rtol=1e-5), "channels-last (C<128) mismatch"

    # --- 3) generic channels-last, C >= 128 direct row kernel (BiasFree), ragged rows.
    xr = jax.random.normal(ks[6], (40, 128), dtype=jnp.float32)
    wr = 0.5 + jax.random.uniform(ks[7], (128,), dtype=jnp.float32)
    outr = jax.block_until_ready(biasfree_layernorm(xr, wr))
    sgr = jnp.var(xr, axis=-1, keepdims=True)
    refr = xr / jnp.sqrt(sgr + 1e-5) * wr
    assert jnp.allclose(outr, refr, atol=1e-5, rtol=1e-5), "channels-last (C>=128) mismatch"

    print("KERNEL_OK")
</pallas_src>

<mosaic_0001>
module attributes {stable_mosaic.version = 11 : i64} {
  func.func @_ln_cfirst_kernel(%arg0: i32, %arg1: i32, %arg2: memref<1x64x128xf32, #tpu.memory_space<vmem>>, %arg3: memref<1x64x1xf32, #tpu.memory_space<vmem>>, %arg4: memref<1x64x1xf32, #tpu.memory_space<vmem>>, %arg5: memref<1x64x128xf32, #tpu.memory_space<vmem>>) attributes {dimension_semantics = [#tpu.dimension_semantics<parallel>, #tpu.dimension_semantics<parallel>], iteration_bounds = array<i64: 2, 2>, scalar_prefetch = 0 : i64, scratch_operands = 0 : i64, tpu.core_type = #tpu.core_type<tc>, window_params = [{transform_indices = @transform_0, window_bounds = array<i64: 1, 64, 128>}, {pipeline_mode = #tpu.pipeline_mode<synchronous>, transform_indices = @transform_1, window_bounds = array<i64: 1, 64, 1>}, {pipeline_mode = #tpu.pipeline_mode<synchronous>, transform_indices = @transform_2, window_bounds = array<i64: 1, 64, 1>}, {transform_indices = @transform_3, window_bounds = array<i64: 1, 64, 128>}]} {
    %c0 = arith.constant 0 : index
    %c0_0 = arith.constant 0 : index
    %c0_1 = arith.constant 0 : index
    %0 = vector.load %arg2[%c0, %c0_0, %c0_1] : memref<1x64x128xf32, #tpu.memory_space<vmem>>, vector<1x64x128xf32>
    %cst = arith.constant dense<0.000000e+00> : vector<1x128xf32>
    %1 = vector.multi_reduction <add>, %0, %cst [1] : vector<1x64x128xf32> to vector<1x128xf32>
    %2 = vector.shape_cast %1 : vector<1x128xf32> to vector<1x1x128xf32>
    %cst_2 = arith.constant 1.562500e-02 : f32
    %3 = vector.broadcast %cst_2 : f32 to vector<1x1x128xf32>
    %4 = arith.mulf %2, %3 : vector<1x1x128xf32>
    %5 = vector.broadcast %4 : vector<1x1x128xf32> to vector<1x64x128xf32>
    %6 = arith.subf %0, %5 : vector<1x64x128xf32>
    %7 = arith.mulf %6, %6 : vector<1x64x128xf32>
    %cst_3 = arith.constant dense<0.000000e+00> : vector<1x128xf32>
    %8 = vector.multi_reduction <add>, %7, %cst_3 [1] : vector<1x64x128xf32> to vector<1x128xf32>
    %9 = vector.shape_cast %8 : vector<1x128xf32> to vector<1x1x128xf32>
    %cst_4 = arith.constant 1.562500e-02 : f32
    %10 = vector.broadcast %cst_4 : f32 to vector<1x1x128xf32>
    %11 = arith.mulf %9, %10 : vector<1x1x128xf32>
    %cst_5 = arith.constant 9.99999974E-6 : f32
    %12 = vector.broadcast %cst_5 : f32 to vector<1x1x128xf32>
    %13 = arith.addf %11, %12 : vector<1x1x128xf32>
    %14 = math.rsqrt %13 : vector<1x1x128xf32>
    %15 = vector.broadcast %14 : vector<1x1x128xf32> to vector<1x64x128xf32>
    %16 = arith.mulf %6, %15 : vector<1x64x128xf32>
    %c0_6 = arith.constant 0 : index
    %c0_7 = arith.constant 0 : index
    %c0_8 = arith.constant 0 : index
    %17 = vector.load %arg3[%c0_6, %c0_7, %c0_8] : memref<1x64x1xf32, #tpu.memory_space<vmem>>, vector<1x64x1xf32>
    %18 = vector.broadcast %17 : vector<1x64x1xf32> to vector<1x64x128xf32>
    %19 = arith.mulf %16, %18 : vector<1x64x128xf32>
    %c0_9 = arith.constant 0 : index
    %c0_10 = arith.constant 0 : index
    %c0_11 = arith.constant 0 : index
    %20 = vector.load %arg4[%c0_9, %c0_10, %c0_11] : memref<1x64x1xf32, #tpu.memory_space<vmem>>, vector<1x64x1xf32>
    %21 = vector.broadcast %20 : vector<1x64x1xf32> to vector<1x64x128xf32>
    %22 = arith.addf %19, %21 : vector<1x64x128xf32>
    %c0_12 = arith.constant 0 : index
    %c0_13 = arith.constant 0 : index
    %c0_14 = arith.constant 0 : index
    %23 = vector.load %arg5[%c0_12, %c0_13, %c0_14] : memref<1x64x128xf32, #tpu.memory_space<vmem>>, vector<1x64x128xf32>
    tpu.vector_store %arg5[%c0_12, %c0_13, %c0_14], %22 {strides = array<i32>} : memref<1x64x128xf32, #tpu.memory_space<vmem>>, vector<1x64x128xf32>,
    return
  }
  func.func @transform_0(%arg0: i32, %arg1: i32) -> (i32, i32, i32) {
    %c0_i32 = arith.constant 0 : i32
    %c0_i32_0 = arith.constant 0 : i32
    return %arg0, %c0_i32, %arg1 : i32, i32, i32
  }
  func.func @transform_1(%arg0: i32, %arg1: i32) -> (i32, i32, i32) {
    %c0_i32 = arith.constant 0 : i32
    %c0_i32_0 = arith.constant 0 : i32
    %c0_i32_1 = arith.constant 0 : i32
    %c0_i32_2 = arith.constant 0 : i32
    return %c0_i32, %c0_i32_0, %c0_i32_1 : i32, i32, i32
  }
  func.func @transform_2(%arg0: i32, %arg1: i32) -> (i32, i32, i32) {
    %c0_i32 = arith.constant 0 : i32
    %c0_i32_0 = arith.constant 0 : i32
    %c0_i32_1 = arith.constant 0 : i32
    %c0_i32_2 = arith.constant 0 : i32
    return %c0_i32, %c0_i32_0, %c0_i32_1 : i32, i32, i32
  }
  func.func @transform_3(%arg0: i32, %arg1: i32) -> (i32, i32, i32) {
    %c0_i32 = arith.constant 0 : i32
    %c0_i32_0 = arith.constant 0 : i32
    return %arg0, %c0_i32, %arg1 : i32, i32, i32
  }
}

</mosaic_0001>

<bundles_post_ra>
// kernel: tpu_custom_call.1
= control target key start
LH: loop header
LB: loop body
LE: loop exit
PB: predicated region body
PF: predicated region fallthrough
CT: control target
= control target key end

     0   :  { %8 = vsyncpa [#allocation3], 0  ;;  %s1006_s0 = inlined_call_operand.hbm [shape: f32[2,64,256], index: 0, kind: input, shape index: {}]   ;;  %s1007_s1 = inlined_call_operand.vmem [shape: f32[1,64,1], index: 1, kind: input, shape index: {}]   ;;  %s1008_s2 = inlined_call_operand.vmem [shape: f32[1,64,1], index: 2, kind: input, shape index: {}]   ;;  %s1009_s3 = inlined_call_operand.hbm [shape: f32[2,64,256], index: 3, kind: output, shape index: {}]  }
   0x1   :  { %10 = vsyncpa [#allocation3 + $0x1], 0 }
   0x2   :  { %11 = vsyncpa [#allocation4], 0 }
   0x3   :  { %13 = vsyncpa [#allocation4 + $0x1], 0  ;;  %s766_s12 = smov 0   ;;  %s768_s13 = smov 0  }
   0x4   :  { %s770_s14 = smov 0   ;;  %s772_s15 = smov 0  }
   0x5   :  { %s774_s16 = smov 0   ;;  %s776_s17 = smov 0  }
   0x6   :  { %s778_s18 = smov 0   ;;  %s780_s19 = smov 0  }
   0x7 LB: > { %s504_s20 = sadd.s32 4294967295, %s737_s19   ;;  %s505_s21 = sadd.s32 4294967294, %s737_s19   ;;  %s737_s19 = sphi %s780_s19, %s19_s19   ;;  %s733_s18 = sphi %s778_s18, %s1028_s18   ;;  %s729_s17 = sphi %s776_s17, %s1027_s17   ;;  %s725_s16 = sphi %s774_s16, %s1026_s16   ;;  %s721_s15 = sphi %s772_s15, %s1025_s15   ;;  %s717_s14 = sphi %s770_s14, %s1024_s14   ;;  %s713_s13 = sphi %s768_s13, %s1023_s13   ;;  %s709_s12 = sphi %s766_s12, %s1022_s12  }
   0x8   : > { %s28_s22 = sadd.s32 1, %s729_s17  ;;  %s31_s23 = sadd.s32 1, %s733_s18 }
   0x9   : > { %p29_p0 = scmp.ge.s32.totalorder %s28_s22, 2  ;;  %s40_s24 = sadd.s32 1, %s717_s14 }
   0xa   : > { %p47_p1 = scmp.ne.s32.totalorder %s717_s14, %s713_s13  ;;  %p48_p2 = scmp.eq.s32.totalorder %s737_s19, 0 }
   0xb   : > { %s1030_s22 = smov (%p29_p0, %s28_s22), 0  ;;  %s1032_s23 = smov (!%p29_p0, %s31_s23), %s733_s18 }
   0xc   : > { %1012 = sst [smem:[#allocation8_spill]] %s1030_s22  ;;  %s36_s25 = ssub.s32 %s729_s17, %s1030_s22 }
   0xd   : > { %p819_p3 = por %p48_p2, %p47_p1  ;;  %p33_p4 = scmp.ge.s32.totalorder %s1032_s23, 2 }
   0xe   : > { %p53_p5 = scmp.ne.s32.totalorder %s713_s13, %s709_s12  ;;  %p54_p6 = scmp.eq.s32.totalorder %s504_s20, 0 }
   0xf   : > { %p121_p7 = scmp.eq.s32.totalorder %s504_s20, 3  ;;  %s1034_s23 = smov (%p33_p4, %s1032_s23), 0 }
  0x10   : > { %1014 = sst [smem:[#allocation9_spill]] %s1034_s23  ;;  %p827_p8 = por %p54_p6, %p53_p5 }
  0x11   : > { %p831_p9 = por %p121_p7, %p47_p1  ;;  %s35_s29 = ssub.s32 %s733_s18, %s1034_s23 }
  0x12   : > { %p127_p10 = scmp.eq.s32.totalorder %s505_s21, 3  ;;  %s37_s30 = sor.u32 %s36_s25, %s35_s29 }
  0x13   : > { %p38_p11 = scmp.eq.s32.totalorder %s37_s30, 0  ;;  %p531_p13 = scmp.lt.s32.totalorder %s737_s19, 4 }
  0x14   : > { %p837_p12 = por %p127_p10, %p53_p5  ;;  %s153_s5 = sand.u32 1, %s717_s14  }
  0x15   : > { %s844_s6 = scalar_select %p38_p11, %s717_s14, %s40_s24  }
  0x16   : > { %s508_s7 = sshll.u32 %s153_s5, 6  ;;  %s509_s8 = sshll.u32 %s733_s18, 4 }
  0x17   : > { %1018 = sst [smem:[#allocation10_spill]] %s844_s6  ;;  %s161_s9 = sadd.s32 %s729_s17, %s509_s8 }
  0x18   : > { %s157_s10 = scalar_lea.vmem [#allocation2], %s508_s7  ;;  %s510_s20 = sshll.u32 %s161_s9, 3 }
  0x19   : > { %s166_s11 = sshll.u32 %s157_s10, 4  ;;  %s163_s29 = scalar_lea.hbm %s1006_s0, %s510_s20  ;;  %s167_s11 = int_to_ptr.vmem [resolvable:$true] %s166_s11 }
  0x1a   : > { %p524_p0 = pnand %p531_p13, %p819_p3  ;;  %s164_s30 = sshll.u32 %s163_s29, 4  ;;  %s165_s30 = int_to_ptr.hbm [resolvable:$true] %s164_s30 }
  0x1b   : > { %s154_s23 = scalar_lea.sflag [#allocation3], %s153_s5  ;;  %s739_s24 = smov 256  }
  0x1c   : > { %s740_s22 = smov 128   ;;  %s741_s6 = smov 8  }
  0x1d   : > { %526 = dma.hbm_to_vmem [thread:$0]  (!%p524_p0), %s165_s30, 1024, %s167_s11, %s154_s23, %s739_s24, %s740_s22, %s741_s6  }
  0x1e   : > { %p511_p1 = scmp.ge.s32.totalorder %s737_s19, 1  ;;  %p174_p2 = scmp.lt.s32.totalorder %s737_s19, 5 }
  0x20   : > { %p175_p4 = pnand %p511_p1, %p174_p2 }
  0x21   : > { %s856_s7 = sand.u32 (!%p175_p4), 1, %s713_s13  }
  0x22   : > { %178 = sbr.rel (%p175_p4) target bundleno = 205 (0xcd), region = 32  ;;  %s512_s26 = sshll.u32 (!%p175_p4), %s856_s7, 6 }
  0x23   : > { %s181_s8 = scalar_lea.sflag (!%p175_p4), [#allocation3], %s856_s7  ;;  %s862_s9 = scalar_lea.vmem (!%p175_p4), [#allocation2], %s512_s26 }
  0x27   : > { %700 = dma.done.wait (%p827_p8), %s181_s8, 1024  }
  0x28   : > { %702 = vsyncadd (%p827_p8), %s181_s8, 4294966272  ;;  %v742_v0 = vmov 0   ;;  %v283_v1 = vld [vmem:[%s1007_s1 + $0x20] sm:$0xff]  ;;  %v281_v2 = vld [vmem:[%s1007_s1 + $0x10] sm:$0xff]  ;;  %s946_s6 = scalar_lea.vmem [#allocation5], %s512_s26  ;;  %s515_s26 = sshll.u32 %s725_s16, 4 }
  0x29   : > { %606 = vset.pattern.permute.xlu2 %v742_v0  ;;  %605 = vset.pattern.permute.xlu1 %v742_v0  ;;  %v279_v3 = vld [vmem:[%s1007_s1] sm:$0xff]  ;;  %v209_v5 = vld [vmem:[%s862_s9 + $0x8] sm:$0xff]  ;;  %v282_v7 = vld [vmem:[%s1007_s1 + $0x18] sm:$0xff]  ;;  %s410_s10 = sadd.s32 %s721_s15, %s515_s26  ;;  %s413_s21 = sshll.u32 %s946_s6, 4  ;;  %s414_s21 = int_to_ptr.vmem [resolvable:$true] %s413_s21 }
  0x2a   : > { %604 = vset.pattern.permute.xlu0 %v742_v0  ;;  %309 = vperm.xlu2 %606, %v283_v1   ;;  %v208_v4 = vld [vmem:[%s862_s9] sm:$0xff]  ;;  %v284_v6 = vld [vmem:[%s1007_s1 + $0x28] sm:$0xff]  ;;  %v210_v8 = vld [vmem:[%s862_s9 + $0x10] sm:$0xff]  ;;  %s516_s11 = sshll.u32 %s410_s10, 3  ;;  %s400_s25 = scalar_lea.sflag [#allocation4], %s856_s7 }
  0x2b   : > { %299 = vperm.xlu1 %605, %v281_v2   ;;  %289 = vperm.xlu0 %604, %v279_v3   ;;  %v216_v9 = vadd.f32 %v209_v5, %v208_v4  ;;  %v280_v10 = vld [vmem:[%s1007_s1 + $0x8] sm:$0xff]  ;;  %v211_v11 = vld [vmem:[%s862_s9 + $0x18] sm:$0xff]  ;;  %v212_v13 = vld [vmem:[%s862_s9 + $0x20] sm:$0xff]  ;;  %s412_s20 = scalar_lea.hbm %s1009_s3, %s516_s11  ;;  %s659_s8 = scalar_lea.hbm %s1009_s3, 256 }
  0x2c   : > { %v213_v15 = vld [vmem:[%s862_s9 + $0x28] sm:$0xff]  ;;  %v214_v17 = vld [vmem:[%s862_s9 + $0x30] sm:$0xff]  ;;  %v335_v18 = vld [vmem:[%s1008_s2] sm:$0xff]  ;;  %s415_s15 = sshll.u32 %s412_s20, 4  ;;  %s416_s15 = int_to_ptr.hbm [resolvable:$true] %s415_s15 }
  0x2d   : > { %v217_v12 = vadd.f32 %v216_v9, %v210_v8  ;;  %v286_v19 = vld [vmem:[%s1007_s1 + $0x38] sm:$0xff]  ;;  %v285_v21 = vld [vmem:[%s1007_s1 + $0x30] sm:$0xff]  ;;  %v336_v29 = vld [vmem:[%s1008_s2 + $0x8] sm:$0xff] }
  0x2e   : > { %v215_v22 = vld [vmem:[%s862_s9 + $0x38] sm:$0xff]  ;;  %v337_v27 = vld [vmem:[%s1008_s2 + $0x10] sm:$0xff]  ;;  %v340_v34 = vld [vmem:[%s1008_s2 + $0x28] sm:$0xff]  ;;  %s653_s9 = sshra.s32 %s416_s15, 4  ;;  %s654_s9 = int_to_ptr.hbm [resolvable:$true] %s653_s9 }
  0x2f   : > { %v218_v14 = vadd.f32 %v217_v12, %v211_v11  ;;  %v338_v26 = vld [vmem:[%s1008_s2 + $0x18] sm:$0xff]  ;;  %v341_v33 = vld [vmem:[%s1008_s2 + $0x30] sm:$0xff]  ;;  %v339_v36 = vld [vmem:[%s1008_s2 + $0x20] sm:$0xff]  ;;  %s655_s29 = scalar_lea.hbm %s654_s9, 64  ;;  %p660_p7 = scmp.lt.s32.totalorder %s654_s9, %s1009_s3 }
  0x30   : > { %v342_v48 = vld [vmem:[%s1008_s2 + $0x38] sm:$0xff]  ;;  %p656_p3 = scmp.ne.s32.totalorder %s654_s9, %s655_s29  ;;  %p661_p8 = scmp.lt.s32.totalorder %s659_s8, %s655_s29 }
  0x31   : > { %v219_v16 = vadd.f32 %v218_v14, %v212_v13 }
  0x32   : > { %314 = vperm.xlu2 %606, %v284_v6   ;;  %p657_p5 = pnand %p656_p3, %p831_p9  ;;  %p662_p10 = por %p661_p8, %p660_p7 }
  0x33   : > { %304 = vperm.xlu1 %605, %v282_v7   ;;  %294 = vperm.xlu0 %604, %v280_v10   ;;  %v220_v20 = vadd.f32 %v219_v16, %v213_v15 }
  0x34   : > { %p658_p6 = pneg %p657_p5 }
  0x35   : > { %v221_v23 = vadd.f32 %v220_v20, %v214_v17 }
  0x36   : > { %p663_p11 = pnand %p662_p10, %p658_p6 }
  0x37   : > { %v222_v24 = vadd.f32 %v221_v23, %v215_v22 }
  0x39   : > { %v223_v25 = vrot.slane %v222_v24, 4 }
  0x3a   : > { %345 = vperm.xlu2 %606, %v335_v18  }
  0x3b   : > { %324 = vperm.xlu1 %605, %v286_v19   ;;  %319 = vperm.xlu0 %604, %v285_v21   ;;  %v224_v28 = vadd.f32 %v223_v25, %v222_v24 }
  0x3d   : > { %v225_v30 = vrot.slane %v224_v28, 2 }
  0x3f   : > { %v226_v31 = vadd.f32 %v225_v30, %v224_v28 }
  0x41   : > { %v227_v32 = vrot.slane %v226_v31, 1 }
  0x42   : > { %360 = vperm.xlu2 %606, %v338_v26  }
  0x43   : > { %355 = vperm.xlu1 %605, %v337_v27   ;;  %350 = vperm.xlu0 %604, %v336_v29   ;;  %v228_v35 = vadd.f32 %v227_v32, %v226_v31 }
  0x45   : > { %v229_v37 = vmul.f32 0.015625, %v228_v35 }
  0x47   : > { %v230_v38 = vsub.f32 %v208_v4, %v229_v37  ;;  %v921_v39 = vsub.f32 %v209_v5, %v229_v37  ;;  %v923_v40 = vsub.f32 %v210_v8, %v229_v37  ;;  %v233_v41 = vsub.f32 %v211_v11, %v229_v37 }
  0x48   : > { %v929_v45 = vsub.f32 %v212_v13, %v229_v37  ;;  %v934_v49 = vsub.f32 %v213_v15, %v229_v37  ;;  %v236_v52 = vsub.f32 %v214_v17, %v229_v37  ;;  %v940_v55 = vsub.f32 %v215_v22, %v229_v37 }
  0x49   : > { %v238_v42 = vmul.f32 %v230_v38, %v230_v38  ;;  %v239_v43 = vmul.f32 %v921_v39, %v921_v39  ;;  %v240_v44 = vmul.f32 %v923_v40, %v923_v40  ;;  %v241_v46 = vmul.f32 %v233_v41, %v233_v41 }
  0x4a   : > { %375 = vperm.xlu2 %606, %v341_v33   ;;  %v242_v50 = vmul.f32 %v929_v45, %v929_v45  ;;  %v243_v53 = vmul.f32 %v934_v49, %v934_v49  ;;  %v244_v56 = vmul.f32 %v236_v52, %v236_v52  ;;  %v245_v58 = vmul.f32 %v940_v55, %v940_v55 }
  0x4b   : > { %370 = vperm.xlu1 %605, %v340_v34   ;;  %365 = vperm.xlu0 %604, %v339_v36   ;;  %v246_v47 = vadd.f32 %v239_v43, %v238_v42 }
  0x4d   : > { %v247_v51 = vadd.f32 %v246_v47, %v240_v44 }
  0x4f   : > { %v248_v54 = vadd.f32 %v247_v51, %v241_v46 }
  0x51   : > { %v249_v57 = vadd.f32 %v248_v54, %v242_v50 }
  0x53   : > { %380 = vperm.xlu0 %604, %v342_v48   ;;  %v250_v59 = vadd.f32 %v249_v57, %v243_v53 }
  0x55   : > { %v251_v60 = vadd.f32 %v250_v59, %v244_v56 }
  0x57   : > { %v252_v61 = vadd.f32 %v251_v60, %v245_v58 }
  0x59   : > { %v253_v62 = vrot.slane %v252_v61, 4 }
  0x5b   : > { %v254_v63 = vadd.f32 %v253_v62, %v252_v61 }
  0x5d   : > { %v255_v0 = vrot.slane %v254_v63, 2 }
  0x5f   : > { %v256_v1 = vadd.f32 %v255_v0, %v254_v63 }
  0x61   : > { %v257_v2 = vrot.slane %v256_v1, 1 }
  0x63   : > { %v258_v3 = vadd.f32 %v257_v2, %v256_v1 }
  0x65   : > { %v259_v4 = vmul.f32 0.015625, %v258_v3 }
  0x67   : > { %v260_v5 = vadd.f32 1e-05, %v259_v4 }
  0x69   : > { %607 = vrsqrt.f32 %v260_v5  ;;  %vm267_vm0 = vweird.f32 %v260_v5 }
  0x6f   : > { %v608_v6 = vpop.eup %607 }
  0x70   : > { %v262_v7 = vmul.f32 %v608_v6, %v260_v5  ;;  %vm268_vm1 = vweird.f32 %v608_v6 }
  0x71   : > { %vm269_vm2 = vmor %vm267_vm0, %vm268_vm1 }
  0x72   : > { %v263_v9 = vmul.f32 %v608_v6, %v262_v7 }
  0x74   : > { %v264_v10 = vmul.f32 0.5, %v263_v9 }
  0x76   : > { %v265_v11 = vsub.f32 1.5, %v264_v10 }
  0x78   : > { %v266_v13 = vmul.f32 %v608_v6, %v265_v11 }
  0x7a   : > { %v270_v14 = vsel %vm269_vm2, %v608_v6, %v266_v13 }
  0x7b   : > { %v271_v15 = vmul.f32 %v270_v14, %v230_v38  ;;  %v274_v21 = vmul.f32 %v270_v14, %v233_v41  ;;  %v277_v27 = vmul.f32 %v270_v14, %v236_v52  ;;  %v273_v31 = vmul.f32 %v270_v14, %v923_v40 }
  0x7c   : > { %v272_v33 = vmul.f32 %v270_v14, %v921_v39  ;;  %v276_v43 = vmul.f32 %v270_v14, %v934_v49  ;;  %v275_v40 = vmul.f32 %v270_v14, %v929_v45  ;;  %v278_v49 = vmul.f32 %v270_v14, %v940_v55 }
  0x84   : > { %v310_v8 = vpop.permute.xlu2 %309 }
  0x85   : > { %v331_v44 = vmul.f32 %v310_v8, %v275_v40 }
  0x8c   : > { %v315_v12 = vpop.permute.xlu2 %314 }
  0x8d   : > { %v332_v39 = vmul.f32 %v315_v12, %v276_v43 }
  0x94   : > { %v346_v16 = vpop.permute.xlu2 %345 }
  0x9c   : > { %v361_v23 = vpop.permute.xlu2 %360 }
  0x9d   : > { %v300_v17 = vpop.permute.xlu1 %299  ;;  %v290_v18 = vpop.permute.xlu0 %289 }
  0x9e   : > { %v327_v19 = vmul.f32 %v290_v18, %v271_v15  ;;  %v329_v35 = vmul.f32 %v300_v17, %v273_v31 }
  0xa0   : > { %v383_v20 = vadd.f32 %v346_v16, %v327_v19 }
  0xa2   : > { %391 = vst [vmem:[%s946_s6] sm:$0xff] %v383_v20 }
  0xa4   : > { %v376_v32 = vpop.permute.xlu2 %375 }
  0xa5   : > { %v305_v22 = vpop.permute.xlu1 %304  ;;  %v295_v25 = vpop.permute.xlu0 %294 }
  0xa6   : > { %v330_v24 = vmul.f32 %v305_v22, %v274_v21  ;;  %v328_v36 = vmul.f32 %v295_v25, %v272_v33 }
  0xa8   : > { %v386_v26 = vadd.f32 %v361_v23, %v330_v24 }
  0xaa   : > { %394 = vst [vmem:[%s946_s6 + $0x18] sm:$0xff] %v386_v26 }
  0xad   : > { %v325_v28 = vpop.permute.xlu1 %324  ;;  %v320_v29 = vpop.permute.xlu0 %319 }
  0xae   : > { %v333_v30 = vmul.f32 %v320_v29, %v277_v27  ;;  %v334_v45 = vmul.f32 %v325_v28, %v278_v49 }
  0xb0   : > { %v389_v34 = vadd.f32 %v376_v32, %v333_v30 }
  0xb2   : > { %397 = vst [vmem:[%s946_s6 + $0x30] sm:$0xff] %v389_v34 }
  0xb5   : > { %v356_v37 = vpop.permute.xlu1 %355  ;;  %v351_v41 = vpop.permute.xlu0 %350 }
  0xb6   : > { %v385_v38 = vadd.f32 %v356_v37, %v329_v35  ;;  %v384_v42 = vadd.f32 %v351_v41, %v328_v36 }
  0xb8   : > { %393 = vst [vmem:[%s946_s6 + $0x10] sm:$0xff] %v385_v38 }
  0xb9   : > { %392 = vst [vmem:[%s946_s6 + $0x8] sm:$0xff] %v384_v42 }
  0xbd   : > { %v371_v46 = vpop.permute.xlu1 %370  ;;  %v366_v48 = vpop.permute.xlu0 %365 }
  0xbe   : > { %v388_v47 = vadd.f32 %v371_v46, %v332_v39  ;;  %v387_v50 = vadd.f32 %v366_v48, %v331_v44 }
  0xc0   : > { %396 = vst [vmem:[%s946_s6 + $0x28] sm:$0xff] %v388_v47 }
  0xc1   : > { %395 = vst [vmem:[%s946_s6 + $0x20] sm:$0xff] %v387_v50 }
  0xc5   : > { %v381_v51 = vpop.permute.xlu0 %380 }
  0xc6   : > { %v390_v52 = vadd.f32 %v381_v51, %v334_v45 }
  0xc8   : > { %398 = vst [vmem:[%s946_s6 + $0x38] sm:$0xff] %v390_v52 }
  0xc9   : > { %666 = shalt.err (!%p663_p11)
}
  0xca   : > { %s743_s7 = smov 128   ;;  %s744_s5 = smov 256  }
  0xcb   : > { %s745_s6 = smov 8  }
  0xcc   : > { %521 = dma.vmem_to_hbm [thread:$0]  (%p831_p9), %s414_s21, 1024, %s416_s15, %s400_s25, %s743_s7, %s744_s5, %s745_s6  }
  0xcd PF: > { %p532_p13 = scmp.ge.s32.totalorder %s737_s19, 2  ;;  %s430_s26 = sand.u32 1, %s709_s12  }
  0xce   : > { %s431_s10 = scalar_lea.sflag [#allocation4], %s430_s26 }
  0xcf   : > { %p528_p0 = pnand %p532_p13, %p837_p12 }
  0xd1   : > { %p529_p1 = pneg %p528_p0 }
  0xd3   : > { %704 = dma.done.wait (%p529_p1), %s431_s10, 1024  }
  0xd4   : > { %706 = vsyncadd (%p529_p1), %s431_s10, 4294966272  ;;  %s19_s19 = sadd.s32 1, %s737_s19   ;;  %s1019_s11 = sld [smem:[#allocation10_spill]] }
  0xd5   : > { %p16_p2 = scmp.ge.s32.totalorder %s19_s19, 6   ;;  %s1020_s28 = sld [smem:[#allocation8_spill]] }
  0xd6   : > { %s1021_s27 = sld [smem:[#allocation9_spill]]  ;;  %s1022_s12 = smov %s713_s13 }
  0xd7   : > { %s1023_s13 = smov %s717_s14  ;;  %s1025_s15 = smov %s729_s17 }
  0xd8   : > { %s1026_s16 = smov %s733_s18  ;;  %18 = sbr.rel (!%p16_p2) target bundleno = 7 (0x7), region = 77 }
  0xda   : > { %s1024_s14 = smov %s1019_s11 }
  0xdb   : > { %s1027_s17 = smov %s1020_s28 }
  0xdc   : > { %s1028_s18 = smov %s1021_s27 }
  0xdd   :  { %437 = vsyncpa [#allocation3], 1 }
  0xde   :  { %439 = vsyncpa [#allocation3 + $0x1], 1 }
  0xdf   :  { %440 = vsyncpa [#allocation4], 1 }
  0xe0   :  { %442 = vsyncpa [#allocation4 + $0x1], 1 }

</bundles_post_ra>
